<compile_context>
chip_gen: v7x
topology: tpu7x:2x2x1
jax: 0.10.0
libtpu: 0.0.40
codegen_flags: <defaults>
</compile_context>

<pallas_src>
import functools
import math

import jax
import jax.numpy as jnp
from jax.experimental import pallas as pl
from jax.experimental.pallas import tpu as pltpu


# ----------------------------------------------------------------------------
# helpers
# ----------------------------------------------------------------------------
def _round_up(n, m):
    return ((n + m - 1) // m) * m


def _padded_bytes(rows, cols, itemsize):
    """VMEM bytes of a 2-D (rows, cols) tile including (8, 128) layout padding."""
    return _round_up(max(int(rows), 1), 8) * _round_up(max(int(cols), 1), 128) * itemsize


def _pick_tile(n, target, mult):
    """Largest tile t <= target with n % t == 0 and t % mult == 0; else n.

    Returning n (the full dimension) is always legal for a BlockSpec.
    """
    if n <= target:
        return n
    t = (target // mult) * mult
    while t >= mult:
        if n % t == 0:
            return t
        t -= mult
    return n


def _vmem_capacity_bytes():
    try:
        return int(pltpu.get_tpu_info().vmem_capacity_bytes)
    except Exception:       # pragma: no cover - conservative fallback
        return 128 * 1024 * 1024


# ----------------------------------------------------------------------------
# linear projection kernel:  y = x @ w + b
# ----------------------------------------------------------------------------
def _linear_kernel(x_ref, w_ref, b_ref, o_ref):
    acc = jnp.dot(x_ref[...], w_ref[...], preferred_element_type=jnp.float32)
    o_ref[...] = (acc + b_ref[...].astype(jnp.float32)).astype(o_ref.dtype)


def _linear(x2d, w, b, *, row_target=512):
    """x2d: (M, K), w: (K, N), b: (N,).  Full K/N per step; rows are tiled."""
    M, K = x2d.shape
    N = w.shape[1]
    TM = _pick_tile(M, row_target, 8)

    # Padding-aware VMEM estimate: double-buffered x/out blocks + weight + bias.
    vmem = (2 * (_padded_bytes(TM, K, 4) + _padded_bytes(TM, N, 4))
            + 2 * _padded_bytes(K, N, 4) + 2 * _padded_bytes(1, N, 4)
            + _padded_bytes(TM, N, 4) + (1 << 20))
    vmem_limit = int(min(max(vmem, 16 << 20), 100 << 20))

    return pl.pallas_call(
        _linear_kernel,
        out_shape=jax.ShapeDtypeStruct((M, N), x2d.dtype),
        grid=(M // TM,),
        in_specs=[
            pl.BlockSpec((TM, K), lambda i: (i, 0)),
            pl.BlockSpec((K, N), lambda i: (0, 0)),
            pl.BlockSpec((1, N), lambda i: (0, 0)),
        ],
        out_specs=pl.BlockSpec((TM, N), lambda i: (i, 0)),
        compiler_params=pltpu.CompilerParams(
            dimension_semantics=("parallel",),
            vmem_limit_bytes=vmem_limit),
    )(x2d, w, b.reshape(1, N))


# ----------------------------------------------------------------------------
# scaled dot-product attention kernel
#   q/k/v blocks arrive in (L, TH*D) layout (projection layout, no transposes);
#   heads are split with static lane slices inside the kernel and the output
#   is written back lane-dense as (TQ, TH*D).
# ----------------------------------------------------------------------------
def _attn_kernel(head_tile, head_dim, has_mask, *refs):
    if has_mask:
        m_ref, q_ref, k_ref, v_ref, o_ref = refs
    else:
        m_ref = None
        q_ref, k_ref, v_ref, o_ref = refs

    q = q_ref[0]                                   # (TQ, TH*D), pre-scaled by 1/temp
    k = k_ref[0]                                   # (Lk, TH*D)
    v = v_ref[0]                                   # (Lk, TH*D)

    if has_mask:
        # additive bias built once per grid step, reused for every head in tile
        bias = jnp.where(m_ref[0] != 0,
                         jnp.float32(-jnp.inf), jnp.float32(0.0))   # (TQ, Lk)

    for h in range(head_tile):                     # static unroll over the head tile
        lo, hi = h * head_dim, (h + 1) * head_dim
        qh = q[:, lo:hi]                           # (TQ, D)
        kh = k[:, lo:hi]                           # (Lk, D)
        vh = v[:, lo:hi]                           # (Lk, D)

        # Q·K^T contracting the last axes (no materialized K^T copy).
        s = jax.lax.dot_general(qh, kh, (((1,), (1,)), ((), ())),
                                preferred_element_type=jnp.float32)  # (TQ, Lk)
        if has_mask:
            s = s + bias

        # numerically stable softmax along the key axis
        row_max = jnp.max(s, axis=-1, keepdims=True)
        e = jnp.exp(s - row_max)
        denom = jnp.sum(e, axis=-1, keepdims=True)

        # dropout on the probabilities == identity (eval mode)
        # Normalize AFTER the P·V matmul (D << Lk multiplies, one fewer temp).
        oh = jax.lax.dot_general(e, vh.astype(e.dtype), (((1,), (0,)), ((), ())),
                                 preferred_element_type=jnp.float32)  # (TQ, D)
        oh = oh * pl.reciprocal(denom)

        o_ref[0, :, lo:hi] = oh.astype(o_ref.dtype)


def _attention(qp, kp, vp, head_num, mask=None):
    """qp: (B, Lq, H*D) pre-scaled by 1/temperature; kp, vp: (B, Lk, H*D);
    mask: optional (B, Lq, Lk) int8 (nonzero == masked), broadcast over heads
    purely via the index_map.  Returns (B, Lq, H*D) in the same layout."""
    B, Lq, HD = qp.shape
    Lk = kp.shape[1]
    D = HD // head_num
    has_mask = mask is not None

    # Generation-aware budgets.
    cap = _vmem_capacity_bytes()
    small_vmem = cap <= 64 * 1024 * 1024           # v7x: 64 MiB per TC
    tq_target = 256 if small_vmem else 512
    budget = (24 << 20) if small_vmem else (64 << 20)
    limit_cap = (48 << 20) if small_vmem else (100 << 20)

    TQ = _pick_tile(Lq, tq_target, 8)

    # Head-tile candidates: the block's last dim TH*D must be a multiple of
    # 128 lanes or equal to the full HD axis (lane-dense blocks, no padding).
    cands = [t for t in range(head_num, 0, -1)
             if head_num % t == 0 and (t == head_num or (t * D) % 128 == 0)]

    def _block_bytes(th):
        thd = th * D
        qb = _padded_bytes(TQ, thd, 4)
        kb = _padded_bytes(Lk, thd, 4)
        ob = _padded_bytes(TQ, thd, 4)
        mb = _padded_bytes(TQ, Lk, 1) if has_mask else 0
        tmp = 4 * _padded_bytes(TQ, Lk, 4) + 2 * _padded_bytes(TQ, thd, 4)
        return 2 * (qb + 2 * kb + ob + mb) + tmp   # double-buffered blocks + temps

    TH = cands[-1]
    for t in cands:
        if _block_bytes(t) <= budget:
            TH = t
            break

    # v7x has 2 TensorCores: make sure the parallel grid has >= 2 steps.
    if small_vmem and B * (head_num // TH) * (Lq // TQ) < 2:
        smaller = [t for t in cands if t < TH]
        if smaller:
            TH = smaller[0]

    grid = (B, head_num // TH, Lq // TQ)

    q_spec = pl.BlockSpec((1, TQ, TH * D), lambda b, h, i: (b, i, h))
    kv_spec = pl.BlockSpec((1, Lk, TH * D), lambda b, h, i: (b, 0, h))
    o_spec = pl.BlockSpec((1, TQ, TH * D), lambda b, h, i: (b, i, h))

    in_specs = [q_spec, kv_spec, kv_spec]
    args = [qp, kp, vp]
    if has_mask:
        # Head broadcast of the mask never touches HBM: index_map ignores h.
        in_specs = [pl.BlockSpec((1, TQ, Lk), lambda b, h, i: (b, i, 0))] + in_specs
        args = [mask] + args

    vmem_limit = int(min(max(_block_bytes(TH) + (1 << 20), 16 << 20), limit_cap))

    kernel = functools.partial(_attn_kernel, TH, D, has_mask)
    return pl.pallas_call(
        kernel,
        out_shape=jax.ShapeDtypeStruct((B, Lq, HD), qp.dtype),
        grid=grid,
        in_specs=in_specs,
        out_specs=o_spec,
        compiler_params=pltpu.CompilerParams(
            dimension_semantics=("parallel", "parallel", "parallel"),
            vmem_limit_bytes=vmem_limit),
    )(*args)


# ----------------------------------------------------------------------------
# full MultiHeadAttention forward
# ----------------------------------------------------------------------------
def multi_head_attention(q, k, v, params, head_num, mask=None):
    """q: (B, Lq, Cq); k, v: (B, Lk, Ck); mask: optional (B, Lq, Lk) bool."""
    B, Lq, Cq = q.shape
    Lk = k.shape[1]
    HD = params["wq"].shape[1]

    # Fold 1/temperature into the Q projection (free) instead of scaling the
    # full (Lq, Lk) score tile inside the attention kernel.
    inv_t = 1.0 / float(HD ** 0.5)
    wq = params["wq"] * inv_t
    bq = params["bq"] * inv_t

    if q is k and k is v and params["wq"].shape[0] == params["wk"].shape[0]:
        # Self-attention: one fused QKV projection (one kernel launch, one read
        # of the activations, wider lane-dense N).
        w_qkv = jnp.concatenate([wq, params["wk"], params["wv"]], axis=1)
        b_qkv = jnp.concatenate([bq, params["bk"], params["bv"]], axis=0)
        proj = _linear(q.reshape(B * Lq, Cq), w_qkv, b_qkv)        # (B*Lq, 3*HD)
        qp = proj[:, :HD].reshape(B, Lq, HD)
        kp = proj[:, HD:2 * HD].reshape(B, Lk, HD)
        vp = proj[:, 2 * HD:].reshape(B, Lk, HD)
    else:
        qp = _linear(q.reshape(B * Lq, Cq), wq, bq).reshape(B, Lq, HD)
        kp = _linear(k.reshape(B * Lk, k.shape[2]), params["wk"],
                     params["bk"]).reshape(B, Lk, HD)
        vp = _linear(v.reshape(B * Lk, v.shape[2]), params["wv"],
                     params["bv"]).reshape(B, Lk, HD)

    mask8 = None if mask is None else mask.astype(jnp.int8)

    # Attention reads/writes the projection layout directly — no transposes.
    out = _attention(qp, kp, vp, head_num, mask8)                  # (B, Lq, HD)

    out = _linear(out.reshape(B * Lq, HD), params["wo"],
                  params["bo"]).reshape(B, Lq, Cq)
    # final dropout == identity (eval mode)
    return out


# ----------------------------------------------------------------------------
# pure-JAX reference
# ----------------------------------------------------------------------------
def _mha_reference(q, k, v, params, head_num, mask=None):
    hp = jax.lax.Precision.HIGHEST

    def lin(x, w, b):
        return jnp.einsum("blc,cn->bln", x, w, precision=hp) + b

    B, Lq, _ = q.shape
    Lk = k.shape[1]
    HD = params["wq"].shape[1]
    D = HD // head_num
    qp = lin(q, params["wq"], params["bq"]).reshape(B, Lq, head_num, D).transpose(0, 2, 1, 3)
    kp = lin(k, params["wk"], params["bk"]).reshape(B, Lk, head_num, D).transpose(0, 2, 1, 3)
    vp = lin(v, params["wv"], params["bv"]).reshape(B, Lk, head_num, D).transpose(0, 2, 1, 3)

    scores = jnp.einsum("bhqd,bhkd->bhqk", qp, kp, precision=hp) / float(HD ** 0.5)
    if mask is not None:
        scores = jnp.where(mask[:, None, :, :], -jnp.inf, scores)
    attn = jax.nn.softmax(scores, axis=-1)
    out = jnp.einsum("bhqk,bhkd->bhqd", attn, vp, precision=hp)
    out = out.transpose(0, 2, 1, 3).reshape(B, Lq, HD)
    return lin(out, params["wo"], params["bo"])


# ----------------------------------------------------------------------------
# test
# ----------------------------------------------------------------------------
if __name__ == "__main__":
    B, Lq, Lk = 2, 8, 8
    q_channels, k_channels, head_num = 64, 32, 4
    head_dim = q_channels // head_num
    hd = head_num * head_dim

    key = jax.random.PRNGKey(0)
    ks = jax.random.split(key, 20)

    def xavier(kk, fan_in, fan_out):
        std = math.sqrt(2.0 / (fan_in + fan_out))
        return std * jax.random.normal(kk, (fan_in, fan_out), jnp.float32)

    params = {
        "wq": xavier(ks[0], q_channels, hd),
        "bq": 0.01 * jax.random.normal(ks[1], (hd,), jnp.float32),
        "wk": xavier(ks[2], k_channels, hd),
        "bk": 0.01 * jax.random.normal(ks[3], (hd,), jnp.float32),
        "wv": xavier(ks[4], k_channels, hd),
        "bv": 0.01 * jax.random.normal(ks[5], (hd,), jnp.float32),
        "wo": xavier(ks[6], hd, q_channels),
        "bo": 0.01 * jax.random.normal(ks[7], (q_channels,), jnp.float32),
    }

    q = jax.random.normal(ks[8], (B, Lq, q_channels), jnp.float32)
    k = jax.random.normal(ks[9], (B, Lk, k_channels), jnp.float32)
    v = jax.random.normal(ks[10], (B, Lk, k_channels), jnp.float32)

    # Boolean mask (True == masked); keep at least one unmasked key per row.
    mask = jax.random.bernoulli(ks[11], 0.3, (B, Lq, Lk))
    mask = mask.at[..., 0].set(False)

    # Cross-attention (distinct q / k / v), masked and unmasked.
    out_m = multi_head_attention(q, k, v, params, head_num, mask=mask)
    out_u = multi_head_attention(q, k, v, params, head_num, mask=None)

    # Self-attention (q is k is v) exercising the fused QKV projection path.
    params_sa = {
        "wq": xavier(ks[12], q_channels, hd),
        "bq": 0.01 * jax.random.normal(ks[13], (hd,), jnp.float32),
        "wk": xavier(ks[14], q_channels, hd),
        "bk": 0.01 * jax.random.normal(ks[15], (hd,), jnp.float32),
        "wv": xavier(ks[16], q_channels, hd),
        "bv": 0.01 * jax.random.normal(ks[17], (hd,), jnp.float32),
        "wo": xavier(ks[18], hd, q_channels),
        "bo": 0.01 * jax.random.normal(ks[19], (q_channels,), jnp.float32),
    }
    out_sa = multi_head_attention(q, q, q, params_sa, head_num, mask=mask)

    jax.block_until_ready((out_m, out_u, out_sa))

    ref_m = _mha_reference(q, k, v, params, head_num, mask=mask)
    ref_u = _mha_reference(q, k, v, params, head_num, mask=None)
    ref_sa = _mha_reference(q, q, q, params_sa, head_num, mask=mask)

    for got, ref, name in ((out_m, ref_m, "masked"),
                           (out_u, ref_u, "unmasked"),
                           (out_sa, ref_sa, "self-attn")):
        err = float(jnp.max(jnp.abs(got - ref)))
        assert jnp.allclose(got, ref, atol=1e-4, rtol=1e-4), (name, err)

    print("KERNEL_OK")
</pallas_src>

<mosaic_0001>
module attributes {stable_mosaic.version = 11 : i64} {
  func.func @_linear_kernel(%arg0: i32, %arg1: memref<16x64xf32, #tpu.memory_space<vmem>>, %arg2: memref<64x64xf32, #tpu.memory_space<vmem>>, %arg3: memref<1x64xf32, #tpu.memory_space<vmem>>, %arg4: memref<16x64xf32, #tpu.memory_space<vmem>>) attributes {dimension_semantics = [#tpu.dimension_semantics<parallel>], iteration_bounds = array<i64: 1>, scalar_prefetch = 0 : i64, scratch_operands = 0 : i64, tpu.core_type = #tpu.core_type<tc>, window_params = [{transform_indices = @transform_0, window_bounds = array<i64: 16, 64>}, {pipeline_mode = #tpu.pipeline_mode<synchronous>, transform_indices = @transform_1, window_bounds = array<i64: 64, 64>}, {pipeline_mode = #tpu.pipeline_mode<synchronous>, transform_indices = @transform_2, window_bounds = array<i64: 1, 64>}, {transform_indices = @transform_3, window_bounds = array<i64: 16, 64>}]} {
    %c0 = arith.constant 0 : index
    %c0_0 = arith.constant 0 : index
    %0 = vector.load %arg1[%c0, %c0_0] : memref<16x64xf32, #tpu.memory_space<vmem>>, vector<16x64xf32>
    %c0_1 = arith.constant 0 : index
    %c0_2 = arith.constant 0 : index
    %1 = vector.load %arg2[%c0_1, %c0_2] : memref<64x64xf32, #tpu.memory_space<vmem>>, vector<64x64xf32>
    %cst = arith.constant dense<0.000000e+00> : vector<16x64xf32>
    %2 = tpu.matmul %0, %1, %cst {dimension_numbers = #tpu.dot_dimension_numbers<[1], [0], [0], [1], [0, 0, 1, 1], [], []>} : vector<16x64xf32>, vector<64x64xf32>, vector<16x64xf32> -> vector<16x64xf32>
    %c0_3 = arith.constant 0 : index
    %c0_4 = arith.constant 0 : index
    %3 = vector.load %arg3[%c0_3, %c0_4] : memref<1x64xf32, #tpu.memory_space<vmem>>, vector<1x64xf32>
    %4 = vector.broadcast %3 : vector<1x64xf32> to vector<16x64xf32>
    %5 = arith.addf %2, %4 : vector<16x64xf32>
    %c0_5 = arith.constant 0 : index
    %c0_6 = arith.constant 0 : index
    %6 = vector.load %arg4[%c0_5, %c0_6] : memref<16x64xf32, #tpu.memory_space<vmem>>, vector<16x64xf32>
    tpu.vector_store %arg4[%c0_5, %c0_6], %5 {strides = array<i32>} : memref<16x64xf32, #tpu.memory_space<vmem>>, vector<16x64xf32>,
    return
  }
  func.func @transform_0(%arg0: i32) -> (i32, i32) {
    %c0_i32 = arith.constant 0 : i32
    %c0_i32_0 = arith.constant 0 : i32
    return %arg0, %c0_i32 : i32, i32
  }
  func.func @transform_1(%arg0: i32) -> (i32, i32) {
    %c0_i32 = arith.constant 0 : i32
    %c0_i32_0 = arith.constant 0 : i32
    %c0_i32_1 = arith.constant 0 : i32
    return %c0_i32, %c0_i32_0 : i32, i32
  }
  func.func @transform_2(%arg0: i32) -> (i32, i32) {
    %c0_i32 = arith.constant 0 : i32
    %c0_i32_0 = arith.constant 0 : i32
    %c0_i32_1 = arith.constant 0 : i32
    return %c0_i32, %c0_i32_0 : i32, i32
  }
  func.func @transform_3(%arg0: i32) -> (i32, i32) {
    %c0_i32 = arith.constant 0 : i32
    %c0_i32_0 = arith.constant 0 : i32
    return %arg0, %c0_i32 : i32, i32
  }
}

</mosaic_0001>

<bundles_post_ra>
// kernel: tpu_custom_call.1
= control target key start
LH: loop header
LB: loop body
LE: loop exit
PB: predicated region body
PF: predicated region fallthrough
CT: control target
= control target key end

     0   :  { %8 = vsyncpa [#allocation3], 0  ;;  %s364_s0 = inlined_call_operand.hbm [shape: f32[16,64], index: 0, kind: input, shape index: {}]   ;;  %s365_s1 = inlined_call_operand.hbm [shape: f32[64,64], index: 1, kind: input, shape index: {}]   ;;  %s366_s2 = inlined_call_operand.vmem [shape: f32[1,64], index: 2, kind: input, shape index: {}]   ;;  %s367_s3 = inlined_call_operand.hbm [shape: f32[16,64], index: 3, kind: output, shape index: {}]  }
   0x1   :  { %9 = vsyncpa [#allocation6], 0 }
   0x2   :  { %10 = vsyncpa [#allocation4], 0  ;;  %s287_s12 = smov [#allocation2]   ;;  %s215_s16 = scalar_lea.hbm %s364_s0, 256 }
   0x3   :  { %s16_s13 = sshll.u32 %s287_s12, 4  ;;  %p216_p0 = scmp.ne.s32.totalorder %s364_s0, %s215_s16  ;;  %s17_s13 = int_to_ptr.vmem [resolvable:$true] %s16_s13 }
   0x4   :  { %p219_p1 = scmp.lt.u32.totalorder %s215_s16, %s364_s0 }
   0x6   :  { %p221_p2 = pnand %p219_p1, %p216_p0 }
   0x8   :  { %224 = shalt.err (!%p221_p2)
}
   0x9   :  { %s225_s21 = scalar_lea.vmem %s17_s13, 256  ;;  %p230_p4 = scmp.lt.s32.totalorder %s17_s13, %s17_s13 }
   0xa   :  { %p226_p3 = scmp.ne.s32.totalorder %s17_s13, %s225_s21  ;;  %p231_p5 = scmp.lt.s32.totalorder %s225_s21, %s225_s21 }
   0xc   :  { %p232_p6 = por %p231_p5, %p230_p4 }
   0xe   :  { %p233_p7 = pnand %p232_p6, %p226_p3 }
  0x10   :  { %236 = shalt.err (!%p233_p7)
}
  0x11   :  { %s288_s22 = smov 128   ;;  %s289_s23 = smov 8  }
  0x12   :  { %22 = dma.hbm_to_vmem [thread:$0]  %s364_s0, 256, %s17_s13, [#allocation3], %s288_s22, %s288_s22, %s289_s23  }
  0x13   :  { %s290_s26 = smov [#allocation5]   ;;  %s237_s30 = scalar_lea.hbm %s365_s1, 1024 }
  0x14   :  { %s28_s27 = sshll.u32 %s290_s26, 4  ;;  %p238_p8 = scmp.ne.s32.totalorder %s365_s1, %s237_s30  ;;  %s29_s27 = int_to_ptr.vmem [resolvable:$true] %s28_s27 }
  0x15   :  { %p241_p9 = scmp.lt.u32.totalorder %s237_s30, %s365_s1 }
  0x17   :  { %p243_p10 = pnand %p241_p9, %p238_p8 }
  0x19   :  { %246 = shalt.err (!%p243_p10)
}
  0x1a   :  { %s247_s8 = scalar_lea.vmem %s29_s27, 1024  ;;  %p252_p12 = scmp.lt.s32.totalorder %s29_s27, %s29_s27 }
  0x1b   :  { %p248_p11 = scmp.ne.s32.totalorder %s29_s27, %s247_s8  ;;  %p253_p13 = scmp.lt.s32.totalorder %s247_s8, %s247_s8 }
  0x1d   :  { %p254_p0 = por %p253_p13, %p252_p12 }
  0x1f   :  { %p255_p1 = pnand %p254_p0, %p248_p11 }
  0x21   :  { %258 = shalt.err (!%p255_p1)
}
  0x22   :  { %34 = dma.hbm_to_vmem [thread:$0]  %s365_s1, 1024, %s29_s27, [#allocation6], %s288_s22, %s288_s22, %s289_s23  }
  0x23   :  { %281 = dma.done.wait [#allocation3], 256  }
  0x24   :  { %282 = vsyncadd [#allocation3], 4294967040 }
  0x25   :  { %283 = dma.done.wait [#allocation6], 1024  }
  0x26   :  { %284 = vsyncadd [#allocation6], 4294966272  ;;  %v45_v0 = vld [vmem:[#allocation5] sm:$0xff]  ;;  %v46_v1 = vld [vmem:[#allocation5 + $0x8] sm:$0xff]  ;;  %vm60_vm0 = vcmask 523264   ;;  %s291_s11 = smov [#allocation7]  }
  0x27   :  { %v47_v2 = vld [vmem:[#allocation5 + $0x10] sm:$0xff]  ;;  %v194_v3 = vpack.c.bf16 %v46_v1, %v45_v0  ;;  %v48_v4 = vld [vmem:[#allocation5 + $0x18] sm:$0xff]  ;;  %v49_v6 = vld [vmem:[#allocation5 + $0x20] sm:$0xff]  ;;  %s149_s12 = sshll.u32 %s291_s11, 4  ;;  %s150_s12 = int_to_ptr.vmem [resolvable:$true] %s149_s12 }
  0x28   :  { %v198_v5 = vpack.c.bf16 %v48_v4, %v47_v2  ;;  %v50_v7 = vld [vmem:[#allocation5 + $0x28] sm:$0xff]  ;;  %v43_v8 = vld [vmem:[#allocation2] sm:$0xff]  ;;  %v52_v11 = vld [vmem:[#allocation5 + $0x38] sm:$0xff]  ;;  %s259_s13 = scalar_lea.vmem %s150_s12, 256  ;;  %p264_p3 = scmp.lt.s32.totalorder %s150_s12, %s150_s12 }
  0x29   :  { %195 = vmatprep.subr.bf16.mxu0 %v194_v3  ;;  %191 = vmatprep.mubr.msk.f32.mxu0 %vm60_vm0, %v43_v8  ;;  %v202_v9 = vpack.c.bf16 %v50_v7, %v49_v6  ;;  %v51_v10 = vld [vmem:[#allocation5 + $0x30] sm:$0xff]  ;;  %v44_v13 = vld [vmem:[#allocation2 + $0x8] sm:$0xff]  ;;  %p260_p2 = scmp.ne.s32.totalorder %s150_s12, %s259_s13  ;;  %p265_p4 = scmp.lt.s32.totalorder %s259_s13, %s259_s13 }
  0x2a   :  { %197 = vmatpush3.bf16.msra.mxu0 %v194_v3  ;;  %v206_v12 = vpack.c.bf16 %v52_v11, %v51_v10  ;;  %v162_v14 = vld [vmem:[%s366_s2] ss:$0 sm:$0xff] }
  0x2b   :  { %199 = vmatprep.subr.bf16.mxu0 %v198_v5  ;;  %p266_p5 = por %p265_p4, %p264_p3 }
  0x2d   :  { %p267_p6 = pnand %p266_p5, %p260_p2 }
  0x2e   :  { %201 = vmatpush3.bf16.msra.mxu0 %v198_v5 }
  0x2f   :  { %203 = vmatprep.subr.bf16.mxu0 %v202_v9 }
  0x32   :  { %205 = vmatpush3.bf16.msra.mxu0 %v202_v9 }
  0x33   :  { %207 = vmatprep.subr.bf16.mxu0 %v206_v12 }
  0x36   :  { %209 = vmatpush3.bf16.msra.mxu0 %v206_v12 }
  0x39   :  { %192 = vmatmul.mubr.msk.f32.vlgmr.msra.gmra.mrb[0].mxu0 %vm60_vm0, %v44_v13 }
 0x10c   :  { %v193_v15 = vpop.f32.mrb[0].mxu0 }
 0x10d   :  { %v139_v16 = vadd.f32 %v193_v15, %v162_v14  ;;  %v133_v17 = vpop.f32.mrb[1].mxu0 }
 0x10e   :  { %v134_v18 = vadd.f32 %v162_v14, %v133_v17 }
 0x10f   :  { %143 = vst.msk [vmem:[#allocation7 + $0x8] sm:$0xff] %vm60_vm0, %v139_v16 }
 0x110   :  { %142 = vst.msk [vmem:[#allocation7] sm:$0xff] %vm60_vm0, %v134_v18 }
 0x111   :  { %270 = shalt.err (!%p267_p6)
}
 0x112   :  { %s271_s15 = scalar_lea.hbm %s367_s3, 256 }
 0x113   :  { %p272_p7 = scmp.ne.s32.totalorder %s367_s3, %s271_s15  ;;  %p275_p8 = scmp.lt.u32.totalorder %s271_s15, %s367_s3 }
 0x115   :  { %p277_p9 = pnand %p275_p8, %p272_p7 }
 0x117   :  { %280 = shalt.err (!%p277_p9)
}
 0x118   :  { %155 = dma.vmem_to_hbm [thread:$0]  %s150_s12, 256, %s367_s3, [#allocation4], %s288_s22, %s288_s22, %s289_s23  }
 0x119   :  { %285 = dma.done.wait [#allocation4], 256  }
 0x11a   :  { %286 = vsyncadd [#allocation4], 4294967040 }
 0x11b   :  { %159 = vsyncpa [#allocation3], 1 }
 0x11c   :  { %160 = vsyncpa [#allocation6], 1 }
 0x11d   :  { %161 = vsyncpa [#allocation4], 1 }

</bundles_post_ra>
